<compile_context>
chip_gen: v5e
topology: v5e:2x2
jax: 0.10.0
libtpu: 0.0.40
codegen_flags: <defaults>
</compile_context>

<pallas_src>
import functools

import numpy as np
import jax
import jax.numpy as jnp
from jax.experimental import pallas as pl
from jax.experimental.pallas import tpu as pltpu


def _round_up(n, m):
    return ((n + m - 1) // m) * m


def _loss_kernel(out_ref, y1_ref, wl_ref, w_ref, lab_ref, sums_ref,
                 *, c, overshoot_limi, uniques):
    """Per-tile weighted conditional L1 + per-lane partial-sum accumulation.

    sums_ref has shape (K+1, TD) and is grid-resident along the row (B) axis:
      row 0     -> per-lane partial sum of x over all rows
      row 1 + i -> per-lane partial sum of x where label == uniques[i]
    The final lane reduction (sum over D) happens in the wrapper.
    """
    # First row-tile of this lane slab: zero the accumulator.
    @pl.when(pl.program_id(1) == 0)
    def _():
        sums_ref[...] = jnp.zeros_like(sums_ref)

    o = out_ref[...]
    y = y1_ref[...]
    wl = wl_ref[...]
    w = w_ref[...]
    lab = lab_ref[...].astype(jnp.int32)   # cheap unpack; keeps the HBM stream small

    # Fused form of:
    #   x = |y - o|; x_over = where(|y|-|o| > 0, x, x*c); x = where(|wl|>lim, x_over, x)
    # i.e. multiply by c exactly when |wl| > lim AND |y| <= |o|.
    apply_c = jnp.logical_and(jnp.abs(wl) > overshoot_limi,
                              jnp.abs(y) <= jnp.abs(o))
    x = jnp.abs(y - o) * jnp.where(apply_c, jnp.float32(c), jnp.float32(1.0)) * w

    # Accumulate per-lane partial sums (direct per-row stores, no concatenate).
    sums_ref[0:1, :] += jnp.sum(x, axis=0, keepdims=True)
    for i, u in enumerate(uniques):                       # static unroll over K groups
        g = jnp.where(lab == u, x, jnp.zeros_like(x))
        sums_ref[i + 1:i + 2, :] += jnp.sum(g, axis=0, keepdims=True)


def l1loss_weight_jyoukenn(outputs, y1, weight_label, weight, label,
                           c, overshoot_limi):
    """Pallas-backed forward pass. Returns (loss, loss_array) like the nn.Module."""
    outputs = jnp.asarray(outputs, jnp.float32)
    y1 = jnp.asarray(y1, jnp.float32)
    weight_label = jnp.asarray(weight_label, jnp.float32)
    weight = jnp.asarray(weight, jnp.float32)

    B, D = outputs.shape

    # Data-dependent unique (mirrors torch.unique's dynamic output) — host side.
    # NOTE: changing the set of labels recompiles the kernel; `label` must be concrete.
    lab_np = np.asarray(label)
    uniques = tuple(int(u) for u in np.unique(lab_np))
    K = len(uniques)

    # Ship label as int8 when it fits -> 4x less HBM traffic for that stream.
    if min(uniques) >= -128 and max(uniques) <= 127:
        lab_dtype = jnp.int8
        lab_bytes = 1
    else:
        lab_dtype = jnp.int32
        lab_bytes = 4
    label = jnp.asarray(label).astype(lab_dtype)

    # Tiling: TB multiple of 32 (int8 sublane packing), TD multiple of 128
    # (lane-dense, 4 KiB contiguous per row DMA).  ~17 MiB double-buffered
    # working set at the full (512, 1024) tile.
    TB = min(512, _round_up(B, 32))
    TD = min(1024, _round_up(D, 128))
    B_pad = _round_up(B, TB)
    D_pad = _round_up(D, TD)

    def _pad(a):
        pb, pd = B_pad - a.shape[0], D_pad - a.shape[1]
        if pb == 0 and pd == 0:
            return a
        return jnp.pad(a, ((0, pb), (0, pd)))   # zero padding => x == 0 there

    outputs, y1, weight_label, weight, label = (
        _pad(outputs), _pad(y1), _pad(weight_label), _pad(weight), _pad(label))

    grid = (D_pad // TD, B_pad // TB)           # (parallel lane slabs, row tiles)

    kernel = functools.partial(
        _loss_kernel,
        c=float(c),
        overshoot_limi=float(overshoot_limi),
        uniques=uniques,
    )

    in_block = pl.BlockSpec((TB, TD), lambda j, i: (i, j))
    out_block = pl.BlockSpec((K + 1, TD), lambda j, i: (0, j))   # resident over i

    cost = pl.CostEstimate(
        flops=int(B_pad * D_pad * (11 + 3 * K)),
        transcendentals=0,
        bytes_accessed=int(B_pad * D_pad * (16 + lab_bytes) + (K + 1) * D_pad * 4),
    )

    partial_sums = pl.pallas_call(
        kernel,
        out_shape=jax.ShapeDtypeStruct((K + 1, D_pad), jnp.float32),
        grid=grid,
        in_specs=[in_block, in_block, in_block, in_block, in_block],
        out_specs=out_block,
        compiler_params=pltpu.CompilerParams(
            dimension_semantics=("parallel", "arbitrary"),
            vmem_limit_bytes=40 * 1024 * 1024),   # > ~17 MiB working set, safe on v7x
        cost_estimate=cost,
    )(outputs, y1, weight_label, weight, label)

    n_total = float(B * D)                      # torch.mean divides by total count
    sums = jnp.sum(partial_sums, axis=-1)       # (K+1,)
    loss = sums[0] / n_total
    loss_array = [sums[1 + i] / n_total for i in range(K)]
    return loss, loss_array


def _reference(outputs, y1, weight_label, weight, label, c, overshoot_limi):
    """Pure-JAX reference mirroring the PyTorch forward, for validation."""
    x = jnp.abs(y1 - outputs)
    x_over = jnp.where(jnp.abs(y1) - jnp.abs(outputs) > 0, x, x * c)
    x = jnp.where(jnp.abs(weight_label) > overshoot_limi, x_over, x)
    x = x * weight
    loss = jnp.mean(x)
    uniques = np.unique(np.asarray(label))
    loss_array = [jnp.mean(jnp.where(label == int(u), x, x * 0)) for u in uniques]
    return loss, loss_array


if __name__ == "__main__":
    # Module hyper-parameters (deterministic, in-script).
    c = 2.0
    overshoot_limi = 0.3

    # Intentionally not (8,128)/(32,128)-aligned: exercises the padding path.
    B, D = 24, 200
    key = jax.random.PRNGKey(0)
    k1, k2, k3, k4, k5 = jax.random.split(key, 5)

    outputs = jax.random.normal(k1, (B, D), jnp.float32)
    y1 = jax.random.normal(k2, (B, D), jnp.float32)
    weight_label = jax.random.normal(k3, (B, D), jnp.float32)
    weight = jax.random.uniform(k4, (B, D), jnp.float32, 0.5, 1.5)
    label = jax.random.randint(k5, (B, D), 0, 3, jnp.int32)  # 3 unique groups

    loss, loss_array = l1loss_weight_jyoukenn(
        outputs, y1, weight_label, weight, label, c, overshoot_limi)
    loss = jax.block_until_ready(loss)
    loss_array = [jax.block_until_ready(v) for v in loss_array]

    # Validate against the pure-JAX reference.
    ref_loss, ref_array = _reference(
        outputs, y1, weight_label, weight, label, c, overshoot_limi)
    np.testing.assert_allclose(np.asarray(loss), np.asarray(ref_loss),
                               rtol=1e-5, atol=1e-5)
    for got, want in zip(loss_array, ref_array):
        np.testing.assert_allclose(np.asarray(got), np.asarray(want),
                                   rtol=1e-5, atol=1e-5)

    print("KERNEL_OK")
</pallas_src>

<mosaic_0001>
module attributes {stable_mosaic.version = 11 : i64} {
  func.func @_loss_kernel(%arg0: i32, %arg1: i32, %arg2: memref<32x256xf32, #tpu.memory_space<vmem>>, %arg3: memref<32x256xf32, #tpu.memory_space<vmem>>, %arg4: memref<32x256xf32, #tpu.memory_space<vmem>>, %arg5: memref<32x256xf32, #tpu.memory_space<vmem>>, %arg6: memref<32x256xi8, #tpu.memory_space<vmem>>, %arg7: memref<4x256xf32, #tpu.memory_space<vmem>>) attributes {dimension_semantics = [#tpu.dimension_semantics<parallel>, #tpu.dimension_semantics<arbitrary>], iteration_bounds = array<i64: 1, 1>, scalar_prefetch = 0 : i64, scratch_operands = 0 : i64, tpu.core_type = #tpu.core_type<tc>, window_params = [{transform_indices = @transform_0, window_bounds = array<i64: 32, 256>}, {transform_indices = @transform_1, window_bounds = array<i64: 32, 256>}, {transform_indices = @transform_2, window_bounds = array<i64: 32, 256>}, {transform_indices = @transform_3, window_bounds = array<i64: 32, 256>}, {transform_indices = @transform_4, window_bounds = array<i64: 32, 256>}, {transform_indices = @transform_5, window_bounds = array<i64: 4, 256>}]} {
    %c0_i32 = arith.constant 0 : i32
    %0 = arith.cmpi eq, %arg1, %c0_i32 : i32
    %1 = arith.extui %0 : i1 to i32
    %c0_i32_0 = arith.constant 0 : i32
    %2 = arith.cmpi ne, %1, %c0_i32_0 : i32
    scf.if %2 {
      %cst_33 = arith.constant 0.000000e+00 : f32
      %55 = vector.broadcast %cst_33 : f32 to vector<4x256xf32>
      %c0_34 = arith.constant 0 : index
      %c0_35 = arith.constant 0 : index
      %56 = vector.load %arg7[%c0_34, %c0_35] : memref<4x256xf32, #tpu.memory_space<vmem>>, vector<4x256xf32>
      tpu.vector_store %arg7[%c0_34, %c0_35], %55 {strides = array<i32>} : memref<4x256xf32, #tpu.memory_space<vmem>>, vector<4x256xf32>,
    } else {
    }
    %c0 = arith.constant 0 : index
    %c0_1 = arith.constant 0 : index
    %3 = vector.load %arg2[%c0, %c0_1] : memref<32x256xf32, #tpu.memory_space<vmem>>, vector<32x256xf32>
    %c0_2 = arith.constant 0 : index
    %c0_3 = arith.constant 0 : index
    %4 = vector.load %arg3[%c0_2, %c0_3] : memref<32x256xf32, #tpu.memory_space<vmem>>, vector<32x256xf32>
    %c0_4 = arith.constant 0 : index
    %c0_5 = arith.constant 0 : index
    %5 = vector.load %arg4[%c0_4, %c0_5] : memref<32x256xf32, #tpu.memory_space<vmem>>, vector<32x256xf32>
    %c0_6 = arith.constant 0 : index
    %c0_7 = arith.constant 0 : index
    %6 = vector.load %arg5[%c0_6, %c0_7] : memref<32x256xf32, #tpu.memory_space<vmem>>, vector<32x256xf32>
    %c0_8 = arith.constant 0 : index
    %c0_9 = arith.constant 0 : index
    %7 = vector.load %arg6[%c0_8, %c0_9] : memref<32x256xi8, #tpu.memory_space<vmem>>, vector<32x256xi8>
    %8 = arith.extsi %7 : vector<32x256xi8> to vector<32x256xi32>
    %9 = math.absf %5 : vector<32x256xf32>
    %cst = arith.constant 3.000000e-01 : f32
    %10 = vector.broadcast %cst : f32 to vector<32x256xf32>
    %11 = arith.cmpf ogt, %9, %10 : vector<32x256xf32>
    %12 = math.absf %4 : vector<32x256xf32>
    %13 = math.absf %3 : vector<32x256xf32>
    %14 = arith.cmpf ole, %12, %13 : vector<32x256xf32>
    %15 = arith.andi %11, %14 : vector<32x256xi1>
    %16 = arith.subf %4, %3 : vector<32x256xf32>
    %17 = math.absf %16 : vector<32x256xf32>
    %cst_10 = arith.constant 2.000000e+00 : f32
    %cst_11 = arith.constant 1.000000e+00 : f32
    %18 = vector.broadcast %cst_10 : f32 to vector<32x256xf32>
    %19 = vector.broadcast %cst_11 : f32 to vector<32x256xf32>
    %20 = arith.select %15, %18, %19 : vector<32x256xi1>, vector<32x256xf32>
    %21 = arith.mulf %17, %20 : vector<32x256xf32>
    %22 = arith.mulf %21, %6 : vector<32x256xf32>
    %c0_12 = arith.constant 0 : index
    %c0_13 = arith.constant 0 : index
    %23 = vector.load %arg7[%c0_12, %c0_13] : memref<4x256xf32, #tpu.memory_space<vmem>>, vector<1x256xf32>
    %cst_14 = arith.constant dense<0.000000e+00> : vector<256xf32>
    %24 = vector.multi_reduction <add>, %22, %cst_14 [0] : vector<32x256xf32> to vector<256xf32>
    %25 = vector.shape_cast %24 : vector<256xf32> to vector<1x256xf32>
    %26 = arith.addf %23, %25 : vector<1x256xf32>
    %c0_15 = arith.constant 0 : index
    %c0_16 = arith.constant 0 : index
    %27 = vector.load %arg7[%c0_15, %c0_16] : memref<4x256xf32, #tpu.memory_space<vmem>>, vector<1x256xf32>
    tpu.vector_store %arg7[%c0_15, %c0_16], %26 {strides = array<i32>} : memref<4x256xf32, #tpu.memory_space<vmem>>, vector<1x256xf32>,
    %c0_i32_17 = arith.constant 0 : i32
    %28 = vector.broadcast %c0_i32_17 : i32 to vector<32x256xi32>
    %29 = arith.cmpi eq, %8, %28 : vector<32x256xi32>
    %cst_18 = arith.constant 0.000000e+00 : f32
    %30 = vector.broadcast %cst_18 : f32 to vector<32x256xf32>
    %31 = arith.select %29, %22, %30 : vector<32x256xi1>, vector<32x256xf32>
    %c1 = arith.constant 1 : index
    %c0_19 = arith.constant 0 : index
    %32 = vector.load %arg7[%c1, %c0_19] : memref<4x256xf32, #tpu.memory_space<vmem>>, vector<1x256xf32>
    %cst_20 = arith.constant dense<0.000000e+00> : vector<256xf32>
    %33 = vector.multi_reduction <add>, %31, %cst_20 [0] : vector<32x256xf32> to vector<256xf32>
    %34 = vector.shape_cast %33 : vector<256xf32> to vector<1x256xf32>
    %35 = arith.addf %32, %34 : vector<1x256xf32>
    %c1_21 = arith.constant 1 : index
    %c0_22 = arith.constant 0 : index
    %36 = vector.load %arg7[%c1_21, %c0_22] : memref<4x256xf32, #tpu.memory_space<vmem>>, vector<1x256xf32>
    tpu.vector_store %arg7[%c1_21, %c0_22], %35 {strides = array<i32>} : memref<4x256xf32, #tpu.memory_space<vmem>>, vector<1x256xf32>,
    %c1_i32 = arith.constant 1 : i32
    %37 = vector.broadcast %c1_i32 : i32 to vector<32x256xi32>
    %38 = arith.cmpi eq, %8, %37 : vector<32x256xi32>
    %cst_23 = arith.constant 0.000000e+00 : f32
    %39 = vector.broadcast %cst_23 : f32 to vector<32x256xf32>
    %40 = arith.select %38, %22, %39 : vector<32x256xi1>, vector<32x256xf32>
    %c2 = arith.constant 2 : index
    %c0_24 = arith.constant 0 : index
    %41 = vector.load %arg7[%c2, %c0_24] : memref<4x256xf32, #tpu.memory_space<vmem>>, vector<1x256xf32>
    %cst_25 = arith.constant dense<0.000000e+00> : vector<256xf32>
    %42 = vector.multi_reduction <add>, %40, %cst_25 [0] : vector<32x256xf32> to vector<256xf32>
    %43 = vector.shape_cast %42 : vector<256xf32> to vector<1x256xf32>
    %44 = arith.addf %41, %43 : vector<1x256xf32>
    %c2_26 = arith.constant 2 : index
    %c0_27 = arith.constant 0 : index
    %45 = vector.load %arg7[%c2_26, %c0_27] : memref<4x256xf32, #tpu.memory_space<vmem>>, vector<1x256xf32>
    tpu.vector_store %arg7[%c2_26, %c0_27], %44 {strides = array<i32>} : memref<4x256xf32, #tpu.memory_space<vmem>>, vector<1x256xf32>,
    %c2_i32 = arith.constant 2 : i32
    %46 = vector.broadcast %c2_i32 : i32 to vector<32x256xi32>
    %47 = arith.cmpi eq, %8, %46 : vector<32x256xi32>
    %cst_28 = arith.constant 0.000000e+00 : f32
    %48 = vector.broadcast %cst_28 : f32 to vector<32x256xf32>
    %49 = arith.select %47, %22, %48 : vector<32x256xi1>, vector<32x256xf32>
    %c3 = arith.constant 3 : index
    %c0_29 = arith.constant 0 : index
    %50 = vector.load %arg7[%c3, %c0_29] : memref<4x256xf32, #tpu.memory_space<vmem>>, vector<1x256xf32>
    %cst_30 = arith.constant dense<0.000000e+00> : vector<256xf32>
    %51 = vector.multi_reduction <add>, %49, %cst_30 [0] : vector<32x256xf32> to vector<256xf32>
    %52 = vector.shape_cast %51 : vector<256xf32> to vector<1x256xf32>
    %53 = arith.addf %50, %52 : vector<1x256xf32>
    %c3_31 = arith.constant 3 : index
    %c0_32 = arith.constant 0 : index
    %54 = vector.load %arg7[%c3_31, %c0_32] : memref<4x256xf32, #tpu.memory_space<vmem>>, vector<1x256xf32>
    tpu.vector_store %arg7[%c3_31, %c0_32], %53 {strides = array<i32>} : memref<4x256xf32, #tpu.memory_space<vmem>>, vector<1x256xf32>,
    return
  }
  func.func @transform_0(%arg0: i32, %arg1: i32) -> (i32, i32) {
    %c0_i32 = arith.constant 0 : i32
    return %arg1, %arg0 : i32, i32
  }
  func.func @transform_1(%arg0: i32, %arg1: i32) -> (i32, i32) {
    %c0_i32 = arith.constant 0 : i32
    return %arg1, %arg0 : i32, i32
  }
  func.func @transform_2(%arg0: i32, %arg1: i32) -> (i32, i32) {
    %c0_i32 = arith.constant 0 : i32
    return %arg1, %arg0 : i32, i32
  }
  func.func @transform_3(%arg0: i32, %arg1: i32) -> (i32, i32) {
    %c0_i32 = arith.constant 0 : i32
    return %arg1, %arg0 : i32, i32
  }
  func.func @transform_4(%arg0: i32, %arg1: i32) -> (i32, i32) {
    %c0_i32 = arith.constant 0 : i32
    return %arg1, %arg0 : i32, i32
  }
  func.func @transform_5(%arg0: i32, %arg1: i32) -> (i32, i32) {
    %c0_i32 = arith.constant 0 : i32
    %c0_i32_0 = arith.constant 0 : i32
    return %c0_i32, %arg0 : i32, i32
  }
}

</mosaic_0001>

<bundles_post_ra>
// kernel: tpu_custom_call.1
= control target key start
LH: loop header
LB: loop body
LE: loop exit
PB: predicated region body
PF: predicated region fallthrough
CT: control target
= control target key end

     0   :  { %10 = vsyncpa [#allocation3], 0  ;;  %s923_s0 = inlined_call_operand.hbm [shape: f32[32,256], index: 0, kind: input, shape index: {}]   ;;  %s924_s1 = inlined_call_operand.hbm [shape: f32[32,256], index: 1, kind: input, shape index: {}]   ;;  %s925_s2 = inlined_call_operand.hbm [shape: f32[32,256], index: 2, kind: input, shape index: {}]   ;;  %s926_s3 = inlined_call_operand.hbm [shape: f32[32,256], index: 3, kind: input, shape index: {}]   ;;  %s927_s4 = inlined_call_operand.hbm [shape: s8[32,256], index: 4, kind: input, shape index: {}]   ;;  %s928_s5 = inlined_call_operand.hbm [shape: f32[4,256], index: 5, kind: output, shape index: {}]  }
   0x1   :  { %11 = vsyncpa [#allocation6], 0 }
   0x2   :  { %12 = vsyncpa [#allocation9], 0 }
   0x3   :  { %13 = vsyncpa [#allocation4], 0  ;;  %s31_s20 = sshll.u32 %s924_s1, 4  ;;  %s573_s21 = smov [#allocation5]   ;;  %s32_s20 = int_to_ptr.hbm [resolvable:$true] %s31_s20 }
   0x4   :  { %s33_s22 = sshll.u32 %s573_s21, 4  ;;  %s57_s25 = sshll.u32 %s926_s3, 4  ;;  %s34_s22 = int_to_ptr.vmem [resolvable:$true] %s33_s22  ;;  %s58_s25 = int_to_ptr.hbm [resolvable:$true] %s57_s25 }
   0x5   :  { %s574_s26 = smov 256   ;;  %s575_s27 = smov 16  }
   0x6   :  { %39 = dma.hbm_to_vmem [thread:$0]  %s32_s20, 1024, %s34_s22, [#allocation6], %s574_s26, %s574_s26, %s575_s27  }
   0x7   :  { %s576_s28 = smov [#allocation8]   ;;  %s18_s7 = sshll.u32 %s923_s0, 4  ;;  %s19_s7 = int_to_ptr.hbm [resolvable:$true] %s18_s7 }
   0x8   :  { %s59_s29 = sshll.u32 %s576_s28, 4  ;;  %s44_s9 = sshll.u32 %s925_s2, 4  ;;  %s60_s29 = int_to_ptr.vmem [resolvable:$true] %s59_s29  ;;  %s45_s9 = int_to_ptr.hbm [resolvable:$true] %s44_s9 }
   0x9   :  { %65 = dma.hbm_to_vmem [thread:$0]  %s58_s25, 1024, %s60_s29, [#allocation9], %s574_s26, %s574_s26, %s575_s27  }
   0xa   :  { %s577_s10 = smov [#allocation2]   ;;  %s578_s3 = smov [#allocation7]  }
   0xb   :  { %s20_s11 = sshll.u32 %s577_s10, 4  ;;  %s46_s12 = sshll.u32 %s578_s3, 4  ;;  %s21_s11 = int_to_ptr.vmem [resolvable:$true] %s20_s11  ;;  %s47_s12 = int_to_ptr.vmem [resolvable:$true] %s46_s12 }
   0xc   :  { %26 = dma.hbm_to_vmem [thread:$0]  %s19_s7, 1024, %s21_s11, [#allocation3], %s574_s26, %s574_s26, %s575_s27  }
   0xd   :  { %s71_s15 = sshll.u32 %s927_s4, 4  ;;  %s579_s0 = smov [#allocation10]   ;;  %s72_s15 = int_to_ptr.hbm [resolvable:$true] %s71_s15 }
   0xe   :  { %52 = dma.hbm_to_vmem [thread:$0]  %s45_s9, 1024, %s47_s12, [#allocation6], %s574_s26, %s574_s26, %s575_s27  }
   0xf   :  { %s73_s16 = sshll.u32 %s579_s0, 4  ;;  %s74_s16 = int_to_ptr.vmem [resolvable:$true] %s73_s16 }
  0x10   :  { %76 = dma.hbm_to_vmem [thread:$0]  %s72_s15, 256, %s74_s16, [#allocation9]  }
  0x11   :  { %565 = dma.done.wait [#allocation3], 1024  }
  0x12   :  { %566 = vsyncadd [#allocation3], 4294966272 }
  0x13   :  { %567 = dma.done.wait [#allocation6], 2048  }
  0x14   :  { %568 = vsyncadd [#allocation6], 4294965248 }
  0x15   :  { %569 = dma.done.wait [#allocation9], 1280  }
  0x16   :  { %570 = vsyncadd [#allocation9], 4294966016  ;;  %v580_v0 = vmov 0.0   ;;  %v628_v1 = vld [vmem:[#allocation2] sm:$0xff]  ;;  %v630_v2 = vld [vmem:[#allocation2 + $0x8] sm:$0xff]  ;;  %v944_v50 = vmov 0 }
  0x17   :  { %101 = vst [vmem:[#allocation11] sm:$0xff] %v580_v0  ;;  %v632_v3 = vld [vmem:[#allocation5] sm:$0xff]  ;;  %v634_v4 = vld [vmem:[#allocation5 + $0x8] sm:$0xff]  ;;  %v636_v5 = vld [vmem:[#allocation2 + $0x10] sm:$0xff]  ;;  %v168_v9 = vand.u32 2147483647, %v628_v1 }
  0x18   :  { %v638_v6 = vld [vmem:[#allocation5 + $0x10] sm:$0xff]  ;;  %v118_v7 = vld [vmem:[#allocation7] sm:$0xff]  ;;  %v119_v8 = vld [vmem:[#allocation7 + $0x8] sm:$0xff]  ;;  %v169_v14 = vand.u32 2147483647, %v630_v2  ;;  %v192_v29 = vsub.f32 %v632_v3, %v628_v1  ;;  %v193_v34 = vsub.f32 %v634_v4, %v630_v2  ;;  %v948_v2 = vmov 0 }
  0x19   :  { %v641_v10 = vld [vmem:[#allocation2 + $0x18] sm:$0xff]  ;;  %v120_v12 = vld [vmem:[#allocation7 + $0x10] sm:$0xff]  ;;  %v122_v15 = vld [vmem:[#allocation7 + $0x20] sm:$0xff]  ;;  %v144_v17 = vand.u32 2147483647, %v118_v7  ;;  %v194_v35 = vsub.f32 %v638_v6, %v636_v5  ;;  %s582_s2 = smov [#allocation11]  }
  0x1a   :  { %v643_v11 = vld [vmem:[#allocation5 + $0x18] sm:$0xff]  ;;  %v123_v16 = vld [vmem:[#allocation7 + $0x28] sm:$0xff]  ;;  %v160_v18 = vand.u32 2147483647, %v632_v3  ;;  %v647_v19 = vld [vmem:[#allocation2 + $0x20] sm:$0xff]  ;;  %s397_s4 = sshll.u32 %s582_s2, 4  ;;  %s398_s4 = int_to_ptr.vmem [resolvable:$true] %s397_s4 }
  0x1b   :  { %v121_v13 = vld [vmem:[#allocation7 + $0x18] sm:$0xff]  ;;  %v124_v20 = vld [vmem:[#allocation7 + $0x30] sm:$0xff]  ;;  %v145_v22 = vand.u32 2147483647, %v119_v8  ;;  %v146_v23 = vand.u32 2147483647, %v120_v12  ;;  %v195_v40 = vsub.f32 %v643_v11, %v641_v10 }
  0x1c   :  { %v125_v21 = vld [vmem:[#allocation7 + $0x38] sm:$0xff]  ;;  %v107_v24 = vld [vmem:[#allocation2 + $0x28] sm:$0xff]  ;;  %v114_v25 = vld [vmem:[#allocation5 + $0x20] sm:$0xff]  ;;  %v147_v27 = vand.u32 2147483647, %v121_v13  ;;  %vm671_vm3 = vcmp.le.f32.partialorder %v160_v18, %v168_v9  ;;  %v258_v9 = vlaneseq  ;;  %s399_s19 = sshll.u32 %s928_s5, 4  ;;  %s400_s19 = int_to_ptr.hbm [resolvable:$true] %s399_s19 }
  0x1d   :  { %v115_v26 = vld [vmem:[#allocation5 + $0x28] sm:$0xff]  ;;  %v161_v28 = vand.u32 2147483647, %v634_v4  ;;  %v116_v30 = vld [vmem:[#allocation5 + $0x30] sm:$0xff]  ;;  %v117_v31 = vld [vmem:[#allocation5 + $0x38] sm:$0xff]  ;;  %v196_v49 = vsub.f32 %v114_v25, %v647_v19 }
  0x1e   :  { %v148_v32 = vand.u32 2147483647, %v122_v15  ;;  %v149_v33 = vand.u32 2147483647, %v123_v16  ;;  %v108_v36 = vld [vmem:[#allocation2 + $0x30] sm:$0xff]  ;;  %v109_v41 = vld [vmem:[#allocation2 + $0x38] sm:$0xff]  ;;  %v197_v53 = vsub.f32 %v115_v26, %v107_v24 }
  0x1f   :  { %v150_v37 = vand.u32 2147483647, %v124_v20  ;;  %v151_v38 = vand.u32 2147483647, %v125_v21  ;;  %v162_v39 = vand.u32 2147483647, %v638_v6  ;;  %vm693_vm8 = vcmp.le.f32.partialorder %v161_v28, %v169_v14 }
  0x20   :  { %vm659_vm0 = vcmp.gt.f32.partialorder %v144_v17, 0.3  ;;  %vm663_vm1 = vcmp.gt.f32.partialorder %v145_v22, 0.3  ;;  %vm667_vm2 = vcmp.gt.f32.partialorder %v146_v23, 0.3  ;;  %v198_v61 = vsub.f32 %v116_v30, %v108_v36 }
  0x21   :  { %vm675_vm4 = vcmp.gt.f32.partialorder %v147_v27, 0.3  ;;  %vm679_vm5 = vcmp.gt.f32.partialorder %v148_v32, 0.3  ;;  %vm683_vm6 = vcmp.gt.f32.partialorder %v149_v33, 0.3  ;;  %v199_v1 = vsub.f32 %v117_v31, %v109_v41  ;;  %vm963_vm9 = vmand %vm663_vm1, %vm693_vm8 }
  0x22   :  { %vm688_vm7 = vcmp.gt.f32.partialorder %v150_v37, 0.3  ;;  %v163_v51 = vand.u32 2147483647, %v643_v11  ;;  %v164_v52 = vand.u32 2147483647, %v114_v25 }
  0x23   :  { %v945_v50 = vsel %vm688_vm7, 4294967295, %v944_v50  ;;  %v165_v54 = vand.u32 2147483647, %v115_v26  ;;  %v166_v55 = vand.u32 2147483647, %v116_v30  ;;  %v127_v15 = vld [vmem:[#allocation8 + $0x8] sm:$0xff] }
  0x24   :  { %v167_v56 = vand.u32 2147483647, %v117_v31  ;;  %v170_v58 = vand.u32 2147483647, %v636_v5  ;;  %v171_v59 = vand.u32 2147483647, %v641_v10 }
  0x25   :  { %v172_v60 = vand.u32 2147483647, %v647_v19  ;;  %v173_v62 = vand.u32 2147483647, %v107_v24  ;;  %v174_v63 = vand.u32 2147483647, %v108_v36 }
  0x26   :  { %v175_v0 = vand.u32 2147483647, %v109_v41  ;;  %vm704_vm10 = vcmp.gt.f32.partialorder %v151_v38, 0.3  ;;  %vm708_vm11 = vcmp.le.f32.partialorder %v162_v39, %v170_v58  ;;  %vm712_vm12 = vcmp.le.f32.partialorder %v163_v51, %v171_v59  ;;  %v126_v10 = vld [vmem:[#allocation8] sm:$0xff]  ;;  %v128_v20 = vld [vmem:[#allocation8 + $0x10] sm:$0xff] }
  0x27   :  { %v949_v2 = vsel %vm704_vm10, 4294967295, %v948_v2  ;;  %vm716_vm13 = vcmp.le.f32.partialorder %v164_v52, %v172_v60  ;;  %v954_v5 = vmov 0  ;;  %vm724_vm15 = vcmp.le.f32.partialorder %v165_v54, %v173_v62  ;;  %v129_v21 = vld [vmem:[#allocation8 + $0x18] sm:$0xff]  ;;  %v130_v27 = vld [vmem:[#allocation8 + $0x20] sm:$0xff]  ;;  %v131_v28 = vld [vmem:[#allocation8 + $0x28] sm:$0xff] }
  0x28   :  { %v955_v5 = vsel %vm716_vm13, 4294967295, %v954_v5  ;;  %v200_v7 = vand.u32 2147483647, %v192_v29  ;;  %v201_v8 = vand.u32 2147483647, %v193_v34  ;;  %vm732_vm10 = vcmp.le.f32.partialorder %v166_v55, %v174_v63  ;;  %vm189_vm14 = vmand %vm683_vm6, %vm724_vm15  ;;  %v134_v37 = vld [vmem:[#allocation10] sm:$0xff] }
  0x29   :  { %v202_v12 = vand.u32 2147483647, %v194_v35  ;;  %v203_v13 = vand.u32 2147483647, %v195_v40  ;;  %v204_v14 = vand.u32 2147483647, %v196_v49  ;;  %vm740_vm7 = vcmp.le.f32.partialorder %v167_v56, %v175_v0  ;;  %vm964_vm13 = vmand %vm667_vm2, %vm708_vm11 }
  0x2a   :  { %v960_v16 = vmov 0  ;;  %v205_v17 = vand.u32 2147483647, %v197_v53  ;;  %v206_v18 = vand.u32 2147483647, %v198_v61  ;;  %v581_v22 = vmov 1.0   ;;  %vm965_vm6 = vmand %vm675_vm4, %vm712_vm12 }
  0x2b   :  { %v961_v16 = vsel %vm740_vm7, 4294967295, %v960_v16  ;;  %v207_v19 = vand.u32 2147483647, %v199_v1  ;;  %vm962_vm7 = vmand %vm659_vm0, %vm671_vm3  ;;  %v209_v24 = vsel %vm963_vm9, 2.0, %v581_v22  ;;  %v210_v25 = vsel %vm964_vm13, 2.0, %v581_v22  ;;  %v135_v38 = vld [vmem:[#allocation10 + $0x8] sm:$0xff] }
  0x2c   :  { %v208_v23 = vsel %vm962_vm7, 2.0, %v581_v22  ;;  %v211_v26 = vsel %vm965_vm6, 2.0, %v581_v22  ;;  %vm966_vm0 = vnez %v945_v50  ;;  %vm967_vm3 = vnez %v955_v5  ;;  %v132_v39 = vld [vmem:[#allocation8 + $0x30] sm:$0xff]  ;;  %v133_v40 = vld [vmem:[#allocation8 + $0x38] sm:$0xff] }
  0x2d   :  { %vm190_vm1 = vmand %vm966_vm0, %vm732_vm10  ;;  %v213_v30 = vsel %vm189_vm14, 2.0, %v581_v22  ;;  %v216_v31 = vmul.f32 %v208_v23, %v200_v7  ;;  %v217_v32 = vmul.f32 %v209_v24, %v201_v8  ;;  %vm969_vm2 = vnez %v961_v16 }
  0x2e   :  { %vm968_vm7 = vmand %vm679_vm5, %vm967_vm3  ;;  %vm970_vm4 = vnez %v949_v2  ;;  %v214_v33 = vsel %vm190_vm1, 2.0, %v581_v22  ;;  %v218_v34 = vmul.f32 %v210_v25, %v202_v12  ;;  %v219_v35 = vmul.f32 %v211_v26, %v203_v13 }
  0x2f   :  { %v212_v29 = vsel %vm968_vm7, 2.0, %v581_v22  ;;  %vm191_vm8 = vmand %vm970_vm4, %vm969_vm2  ;;  %v221_v42 = vmul.f32 %v213_v30, %v205_v17  ;;  %v222_v43 = vmul.f32 %v214_v33, %v206_v18  ;;  %v785_v44 = vmul.f32 %v216_v31, %v126_v10 }
  0x30   :  { %v220_v36 = vmul.f32 %v212_v29, %v204_v14  ;;  %v215_v41 = vsel %vm191_vm8, 2.0, %v581_v22  ;;  %v787_v46 = vmul.f32 %v217_v32, %v127_v15  ;;  %v789_v47 = vmul.f32 %v218_v34, %v128_v20 }
  0x31   :  { %v223_v45 = vmul.f32 %v215_v41, %v207_v19  ;;  %v791_v48 = vmul.f32 %v219_v35, %v129_v21  ;;  %v795_v50 = vmul.f32 %v221_v42, %v131_v28  ;;  %v797_v51 = vunpack.c.0.s8 %v134_v37 }
  0x32   :  { %v793_v49 = vmul.f32 %v220_v36, %v130_v27  ;;  %v799_v52 = vunpack.c.0.s8 %v135_v38  ;;  %v801_v53 = vmul.f32 %v222_v43, %v132_v39  ;;  %v233_v55 = vadd.f32 %v789_v47, %v785_v44 }
  0x33   :  { %v803_v54 = vmul.f32 %v223_v45, %v133_v40  ;;  %v242_v56 = vadd.f32 %v791_v48, %v787_v46  ;;  %v809_v57 = vunpack.c.1.s8 %v134_v37  ;;  %v811_v58 = vunpack.c.1.s8 %v135_v38 }
  0x34   :  { %v813_v59 = vunpack.c.2.s8 %v134_v37  ;;  %v815_v60 = vunpack.c.2.s8 %v135_v38  ;;  %v234_v61 = vadd.f32 %v233_v55, %v793_v49  ;;  %v819_v63 = vunpack.c.3.s8 %v134_v37 }
  0x35   :  { %v243_v62 = vadd.f32 %v242_v56, %v795_v50  ;;  %v821_v0 = vunpack.c.3.s8 %v135_v38  ;;  %vm263_vm5 = vcmp.eq.s32.totalorder %v797_v51, 0  ;;  %vm264_vm9 = vcmp.eq.s32.totalorder %v799_v52, 0 }
  0x36   :  { %vm265_vm10 = vcmp.eq.s32.totalorder %v809_v57, 0  ;;  %vm266_vm11 = vcmp.eq.s32.totalorder %v811_v58, 0  ;;  %v235_v1 = vadd.f32 %v234_v61, %v801_v53  ;;  %vm267_vm12 = vcmp.eq.s32.totalorder %v813_v59, 0 }
  0x37   :  { %v244_v2 = vadd.f32 %v243_v62, %v803_v54  ;;  %vm268_vm13 = vcmp.eq.s32.totalorder %v815_v60, 0  ;;  %vm269_vm14 = vcmp.eq.s32.totalorder %v819_v63, 0  ;;  %vm270_vm15 = vcmp.eq.s32.totalorder %v821_v0, 0 }
  0x38   :  { %v271_v3 = vsel %vm263_vm5, %v785_v44, 0.0  ;;  %v272_v4 = vsel %vm264_vm9, %v787_v46, 0.0  ;;  %v236_v5 = vrot.slane %v235_v1, 4  ;;  %v273_v7 = vsel %vm265_vm10, %v789_v47, 0.0 }
  0x39   :  { %v245_v6 = vrot.slane %v244_v2, 4  ;;  %v274_v8 = vsel %vm266_vm11, %v791_v48, 0.0  ;;  %v275_v10 = vsel %vm267_vm12, %v793_v49, 0.0  ;;  %v276_v11 = vsel %vm268_vm13, %v795_v50, 0.0 }
  0x3a   :  { %v277_v12 = vsel %vm269_vm14, %v801_v53, 0.0  ;;  %v278_v13 = vsel %vm270_vm15, %v803_v54, 0.0  ;;  %v237_v14 = vadd.f32 %v236_v5, %v235_v1  ;;  %v281_v16 = vadd.f32 %v273_v7, %v271_v3 }
  0x3b   :  { %v246_v15 = vadd.f32 %v245_v6, %v244_v2  ;;  %v290_v17 = vadd.f32 %v274_v8, %v272_v4  ;;  %vm254_vm6 = vcmask 1040384   ;;  %vm306_vm0 = vcmp.eq.s32.totalorder %v797_v51, 1 }
  0x3c   :  { %vm307_vm1 = vcmp.eq.s32.totalorder %v799_v52, 1  ;;  %vm308_vm3 = vcmp.eq.s32.totalorder %v809_v57, 1  ;;  %vm309_vm7 = vcmp.eq.s32.totalorder %v811_v58, 1  ;;  %v238_v18 = vrot.slane %v237_v14, 2 }
  0x3d   :  { %v247_v19 = vrot.slane %v246_v15, 2  ;;  %v282_v20 = vadd.f32 %v281_v16, %v275_v10  ;;  %v291_v21 = vadd.f32 %v290_v17, %v276_v11  ;;  %vm310_vm2 = vcmp.eq.s32.totalorder %v813_v59, 1 }
  0x3e   :  { %vm311_vm4 = vcmp.eq.s32.totalorder %v815_v60, 1  ;;  %vm312_vm8 = vcmp.eq.s32.totalorder %v819_v63, 1  ;;  %vm313_vm5 = vcmp.eq.s32.totalorder %v821_v0, 1  ;;  %v239_v22 = vadd.f32 %v238_v18, %v237_v14 }
  0x3f   :  { %v248_v23 = vadd.f32 %v247_v19, %v246_v15  ;;  %v283_v24 = vadd.f32 %v282_v20, %v277_v12  ;;  %v292_v25 = vadd.f32 %v291_v21, %v278_v13  ;;  %v314_v26 = vsel %vm306_vm0, %v785_v44, 0.0 }
  0x40   :  { %v315_v27 = vsel %vm307_vm1, %v787_v46, 0.0  ;;  %v316_v28 = vsel %vm308_vm3, %v789_v47, 0.0  ;;  %v317_v29 = vsel %vm309_vm7, %v791_v48, 0.0  ;;  %v240_v30 = vrot.slane %v239_v22, 1 }
  0x41   :  { %v249_v31 = vrot.slane %v248_v23, 1  ;;  %v284_v32 = vrot.slane %v283_v24, 4  ;;  %v293_v33 = vrot.slane %v292_v25, 4  ;;  %vm862_vm9 = vcmp.lt.s32.totalorder %v258_v9, 256 }
  0x42   :  { %v318_v35 = vsel %vm310_vm2, %v793_v49, 0.0  ;;  %v319_v36 = vsel %vm311_vm4, %v795_v50, 0.0  ;;  %v320_v37 = vsel %vm312_vm8, %v801_v53, 0.0  ;;  %v241_v38 = vadd.f32 %v240_v30, %v239_v22  ;;  %v232_v9 = vld [vmem:[#allocation11] ss:$4 sm:$0x3] }
  0x43   :  { %v250_v39 = vadd.f32 %v249_v31, %v248_v23  ;;  %v285_v40 = vadd.f32 %v284_v32, %v283_v24  ;;  %v294_v41 = vadd.f32 %v293_v33, %v292_v25  ;;  %v321_v42 = vsel %vm313_vm5, %v803_v54, 0.0  ;;  %v323_v31 = vld [vmem:[#allocation11 + $0x2] ss:$4 sm:$0x3] }
  0x44   :  { %v324_v43 = vadd.f32 %v316_v28, %v314_v26  ;;  %v333_v45 = vadd.f32 %v317_v29, %v315_v27  ;;  %vm349_vm10 = vcmp.eq.s32.totalorder %v797_v51, 2  ;;  %vm350_vm11 = vcmp.eq.s32.totalorder %v799_v52, 2  ;;  %v280_v52 = vld [vmem:[#allocation11 + $0x1] ss:$4 sm:$0x3] }
  0x45   :  { %v253_v55 = vrot.slane %v250_v39, 7  ;;  %v286_v56 = vrot.slane %v285_v40, 2  ;;  %v295_v61 = vrot.slane %v294_v41, 2  ;;  %vm351_vm12 = vcmp.eq.s32.totalorder %v809_v57, 2 }
  0x46   :  { %v325_v62 = vadd.f32 %v324_v43, %v318_v35  ;;  %v334_v1 = vadd.f32 %v333_v45, %v319_v36  ;;  %vm352_vm13 = vcmp.eq.s32.totalorder %v811_v58, 2  ;;  %vm353_vm14 = vcmp.eq.s32.totalorder %v813_v59, 2  ;;  %v366_v43 = vld [vmem:[#allocation11 + $0x3] ss:$4 sm:$0x3] }
  0x47   :  { %v255_v2 = vsel %vm254_vm6, %v241_v38, %v253_v55  ;;  %v287_v3 = vadd.f32 %v286_v56, %v285_v40  ;;  %v296_v4 = vadd.f32 %v295_v61, %v294_v41  ;;  %vm354_vm15 = vcmp.eq.s32.totalorder %v815_v60, 2 }
  0x48   :  { %v257_v5 = vadd.f32 %v255_v2, %v232_v9  ;;  %v326_v6 = vadd.f32 %v325_v62, %v320_v37  ;;  %v335_v7 = vadd.f32 %v334_v1, %v321_v42  ;;  %vm355_vm0 = vcmp.eq.s32.totalorder %v819_v63, 2 }
  0x49   :  { %v288_v8 = vrot.slane %v287_v3, 1  ;;  %v297_v10 = vrot.slane %v296_v4, 1  ;;  %v357_v11 = vsel %vm349_vm10, %v785_v44, 0.0  ;;  %v358_v14 = vsel %vm350_vm11, %v787_v46, 0.0 }
  0x4a   :  { %262 = vst.msk [vmem:[#allocation11] ss:$4 sm:$0x3] %vm862_vm9, %v257_v5  ;;  %v327_v12 = vrot.slane %v326_v6, 4  ;;  %v336_v13 = vrot.slane %v335_v7, 4  ;;  %v359_v17 = vsel %vm351_vm12, %v789_v47, 0.0 }
  0x4b   :  { %v289_v15 = vadd.f32 %v288_v8, %v287_v3  ;;  %v298_v16 = vadd.f32 %v297_v10, %v296_v4  ;;  %v360_v51 = vsel %vm352_vm13, %v791_v48, 0.0  ;;  %vm356_vm1 = vcmp.eq.s32.totalorder %v821_v0, 2 }
  0x4c   :  { %v328_v44 = vadd.f32 %v327_v12, %v326_v6  ;;  %v337_v18 = vadd.f32 %v336_v13, %v335_v7  ;;  %v361_v19 = vsel %vm353_vm14, %v793_v49, 0.0  ;;  %v362_v20 = vsel %vm354_vm15, %v795_v50, 0.0 }
  0x4d   :  { %v301_v46 = vrot.slane %v298_v16, 7  ;;  %v367_v57 = vadd.f32 %v359_v17, %v357_v11  ;;  %v363_v48 = vsel %vm355_vm0, %v801_v53, 0.0  ;;  %v376_v58 = vadd.f32 %v360_v51, %v358_v14 }
  0x4e   :  { %v329_v47 = vrot.slane %v328_v44, 2  ;;  %v338_v21 = vrot.slane %v337_v18, 2  ;;  %v364_v22 = vsel %vm356_vm1, %v803_v54, 0.0 }
  0x4f   :  { %v302_v0 = vsel %vm254_vm6, %v289_v15, %v301_v46  ;;  %v368_v59 = vadd.f32 %v367_v57, %v361_v19  ;;  %v377_v25 = vadd.f32 %v376_v58, %v362_v20 }
  0x50   :  { %v304_v49 = vadd.f32 %v302_v0, %v280_v52  ;;  %v330_v23 = vadd.f32 %v329_v47, %v328_v44  ;;  %v339_v24 = vadd.f32 %v338_v21, %v337_v18 }
  0x51   :  { %v369_v26 = vadd.f32 %v368_v59, %v363_v48  ;;  %v378_v27 = vadd.f32 %v377_v25, %v364_v22 }
  0x52   :  { %305 = vst.msk [vmem:[#allocation11 + $0x1] ss:$4 sm:$0x3] %vm862_vm9, %v304_v49  ;;  %v331_v50 = vrot.slane %v330_v23, 1  ;;  %v340_v60 = vrot.slane %v339_v24, 1 }
  0x53   :  { %v370_v28 = vrot.slane %v369_v26, 4  ;;  %v379_v29 = vrot.slane %v378_v27, 4 }
  0x54   :  { %v332_v63 = vadd.f32 %v331_v50, %v330_v23  ;;  %v341_v53 = vadd.f32 %v340_v60, %v339_v24 }
  0x55   :  { %v371_v30 = vadd.f32 %v370_v28, %v369_v26  ;;  %v380_v54 = vadd.f32 %v379_v29, %v378_v27 }
  0x56   :  { %v344_v32 = vrot.slane %v341_v53, 7 }
  0x57   :  { %v372_v33 = vrot.slane %v371_v30, 2  ;;  %v381_v36 = vrot.slane %v380_v54, 2 }
  0x58   :  { %v345_v35 = vsel %vm254_vm6, %v332_v63, %v344_v32 }
  0x59   :  { %v347_v37 = vadd.f32 %v345_v35, %v323_v31  ;;  %v373_v38 = vadd.f32 %v372_v33, %v371_v30  ;;  %v382_v39 = vadd.f32 %v381_v36, %v380_v54 }
  0x5b   :  { %348 = vst.msk [vmem:[#allocation11 + $0x2] ss:$4 sm:$0x3] %vm862_vm9, %v347_v37  ;;  %v374_v40 = vrot.slane %v373_v38, 1  ;;  %v383_v41 = vrot.slane %v382_v39, 1 }
  0x5d   :  { %v375_v9 = vadd.f32 %v374_v40, %v373_v38  ;;  %v384_v42 = vadd.f32 %v383_v41, %v382_v39 }
  0x5f   :  { %v387_v45 = vrot.slane %v384_v42, 7 }
  0x61   :  { %v388_v55 = vsel %vm254_vm6, %v375_v9, %v387_v45 }
  0x62   :  { %v390_v56 = vadd.f32 %v388_v55, %v366_v43 }
  0x64   :  { %391 = vst.msk [vmem:[#allocation11 + $0x3] ss:$4 sm:$0x3] %vm862_vm9, %v390_v56 }
  0x65   :  { %402 = dma.vmem_to_hbm [thread:$0]  %s398_s4, 128, %s400_s19, [#allocation4]  }
  0x66   :  { %571 = dma.done.wait [#allocation4], 128  }
  0x67   :  { %572 = vsyncadd [#allocation4], 4294967168 }
  0x68   :  { %407 = vsyncpa [#allocation3], 1 }
  0x69   :  { %408 = vsyncpa [#allocation6], 1 }
  0x6a   :  { %409 = vsyncpa [#allocation9], 1 }
  0x6b   :  { %410 = vsyncpa [#allocation4], 1 }

</bundles_post_ra>
